<compile_context>
chip_gen: v7x
topology: tpu7x:2x2x1
jax: 0.10.0
libtpu: 0.0.40
codegen_flags: <defaults>
</compile_context>

<pallas_src>
import functools

import jax
import jax.numpy as jnp
from jax.experimental import pallas as pl
from jax.experimental.pallas import tpu as pltpu

EPS = 1e-5


# ------------------------------ small helpers -------------------------------

def _round_up(x, m):
    return ((x + m - 1) // m) * m


def _largest_divisor_leq(n, cap):
    cap = max(1, min(n, cap))
    for d in range(cap, 0, -1):
        if n % d == 0:
            return d
    return 1


def _vmem_limit(block_bytes):
    """Per-kernel scoped-VMEM budget: blocks (double buffered) + temps + margin."""
    need = 4 * int(block_bytes) + (8 << 20)
    return int(min(max(need, 24 << 20), 40 << 20))


def _apply_act(y, act):
    if act == "silu":
        return y * jax.nn.sigmoid(y)
    if act == "relu":
        return jnp.maximum(y, 0.0)
    if act == "sigmoid":
        return jax.nn.sigmoid(y)
    return y


# ------------------------- generic tiled matmul (stem) ----------------------

def _matmul_bias_act_kernel(x_ref, w_ref, b_ref, o_ref, *, act):
    y = jnp.dot(x_ref[...], w_ref[...], preferred_element_type=jnp.float32)
    y = y + b_ref[...]
    o_ref[...] = _apply_act(y, act).astype(o_ref.dtype)


def matmul_bias_act(x, w, b, act="none", tile_m=1024):
    """y = act(x @ w + b); bf16 inputs, f32 accumulation, bf16 output."""
    M, K = x.shape
    N = w.shape[1]
    x = x.astype(jnp.bfloat16)
    w = w.astype(jnp.bfloat16)
    b2 = b.reshape(1, N).astype(jnp.float32)
    if M <= tile_m:
        tile_m = M                       # single full-extent tile, no padding needed
    Mp = _round_up(M, tile_m)
    if Mp != M:
        x = jnp.pad(x, ((0, Mp - M), (0, 0)))
    kern = functools.partial(_matmul_bias_act_kernel, act=act)
    blk = tile_m * (K + N) * 2 + K * N * 2
    out = pl.pallas_call(
        kern,
        out_shape=jax.ShapeDtypeStruct((Mp, N), jnp.bfloat16),
        grid=(Mp // tile_m,),
        in_specs=[
            pl.BlockSpec((tile_m, K), lambda i: (i, 0)),
            pl.BlockSpec((K, N), lambda i: (0, 0)),
            pl.BlockSpec((1, N), lambda i: (0, 0)),
        ],
        out_specs=pl.BlockSpec((tile_m, N), lambda i: (i, 0)),
        compiler_params=pltpu.CompilerParams(
            dimension_semantics=("parallel",),
            vmem_limit_bytes=_vmem_limit(blk)),
    )(x, w, b2)
    return out[:M] if Mp != M else out


def conv2d_bn_act(x, w_folded, b_folded, k, s, act):
    """Dense conv via im2col + gridded Pallas matmul; only used for the 3-channel stem.
    TODO(synk): build the im2col patches inside a Pallas kernel instead of XLA stack."""
    B, H, W, Cin = x.shape
    p = (k - 1) // 2
    xp = jnp.pad(x, ((0, 0), (p, p), (p, p), (0, 0)))
    Ho = (H + 2 * p - k) // s + 1
    Wo = (W + 2 * p - k) // s + 1
    pats = [xp[:, dy:dy + s * Ho:s, dx:dx + s * Wo:s, :]
            for dy in range(k) for dx in range(k)]
    col = jnp.stack(pats, axis=3).reshape(B * Ho * Wo, k * k * Cin)
    y = matmul_bias_act(col, w_folded, b_folded, act=act)
    return y.reshape(B, Ho, Wo, -1)


# -------------- fused expand + depthwise + SE(pool + MLP) kernel ------------

def _group_taps(k, s):
    """Group the k*k depthwise taps by (phase, column shift) -> ((ro, tap_idx), ...)."""
    groups = {}
    n_phase = 1 if s == 1 else 4
    for dy in range(k):
        for dx in range(k):
            ti = dy * k + dx
            if s == 1:
                ph, ro, co = 0, dy, dx
            else:
                ph, ro, co = (dy % 2) * 2 + (dx % 2), dy // 2, dx // 2
            groups.setdefault(ph, {}).setdefault(co, []).append((ro, ti))
    taps = []
    for ph in range(n_phase):
        per_co = groups.get(ph, {})
        taps.append(tuple((co, tuple(per_co[co])) for co in sorted(per_co)))
    return n_phase, tuple(taps)


def _mbconv_front_kernel(*refs, n_phase, has_expand, taps, th, wo, n_tiles, inv_hw):
    strip_refs = refs[:n_phase]
    we_ref = refs[n_phase] if has_expand else None
    (dww_ref, dwb_ref, w1_ref, b1_ref, w2_ref, b2_ref,
     h_ref, scale_ref, pool_ref) = refs[n_phase + (1 if has_expand else 0):]

    t = pl.program_id(1)

    @pl.when(t == 0)
    def _init():
        pool_ref[...] = jnp.zeros_like(pool_ref)

    acc = None
    for ph in range(n_phase):
        if has_expand:
            xs = strip_refs[ph][0]                          # (Sh, W8, Cin+1) bf16
            sh, w8, cina = xs.shape
            z = jnp.dot(xs.reshape(sh * w8, cina), we_ref[...],
                        preferred_element_type=jnp.float32)
            z = z * jax.nn.sigmoid(z)                       # expand SiLU; pads stay 0
            e = z.reshape(sh, w8, z.shape[-1])              # (Sh, W8, Cexp) f32
        for co, tap_list in taps[ph]:                       # column shifts hoisted (k, not k*k)
            if has_expand:
                ecol = e[:, co:co + wo, :]
            else:
                ecol = strip_refs[ph][0, :, co:co + wo, :].astype(jnp.float32)
            for ro, ti in tap_list:
                term = ecol[ro:ro + th] * dww_ref[ti]       # dw weights kept f32
                acc = term if acc is None else acc + term
    y = acc + dwb_ref[...]
    y = y * jax.nn.sigmoid(y)                               # depthwise SiLU
    h_ref[0] = y.astype(h_ref.dtype)
    # Squeeze-excite pooled sum fused into this kernel (no extra HBM pass).
    pool_ref[...] += jnp.sum(jnp.sum(y, axis=1), axis=0, keepdims=True)

    @pl.when(t == n_tiles - 1)
    def _finalize():
        pooled = pool_ref[...] * inv_hw                     # (1, Cexp) global average
        z = jnp.dot(pooled.astype(jnp.bfloat16), w1_ref[...],
                    preferred_element_type=jnp.float32) + b1_ref[...]
        z = z * jax.nn.sigmoid(z)                           # SE squeeze SiLU
        z = jnp.dot(z.astype(jnp.bfloat16), w2_ref[...],
                    preferred_element_type=jnp.float32) + b2_ref[...]
        scale_ref[0] = jax.nn.sigmoid(z)                    # (1, Cexp) channel scale


def mbconv_front(x, expand_wb, dw_wb, se_params, k, s, target_pos=2048):
    """Fused [optional expand 1x1 + BN + SiLU] -> depthwise kxk + BN + SiLU -> SE pool+MLP.

    Returns (h, scale): h = depthwise output (B, Ho, Wo, Cexp) bf16,
    scale = squeeze-excite per-channel scale (B, 1, Cexp) f32."""
    B, H, W, Cin = x.shape
    assert s in (1, 2)
    p = (k - 1) // 2
    Ho = (H + 2 * p - k) // s + 1
    Wo = (W + 2 * p - k) // s + 1

    has_expand = expand_wb is not None
    if has_expand:
        we, be = expand_wb
        cexp = we.shape[1]
        # Fold the expand bias into an all-ones indicator channel: spatial zero-padding
        # then expands to exactly 0 after bias+SiLU (== padding the expanded activation).
        we_aug = jnp.concatenate(
            [we.astype(jnp.bfloat16), be.reshape(1, -1).astype(jnp.bfloat16)], axis=0)
        xa = jnp.concatenate(
            [x.astype(jnp.bfloat16), jnp.ones((B, H, W, 1), jnp.bfloat16)], axis=-1)
    else:
        cexp = Cin
        we_aug = None
        xa = x.astype(jnp.bfloat16)
    caug = xa.shape[-1]

    xp = jnp.pad(xa, ((0, 0), (p, p), (p, p), (0, 0)))
    n_phase, taps = _group_taps(k, s)
    if s == 1:
        phases = [xp]
        halo = k - 1
        co_max = k - 1
    else:
        Hp, Wp = xp.shape[1], xp.shape[2]
        xp = jnp.pad(xp, ((0, 0), (0, Hp % 2), (0, Wp % 2), (0, 0)))
        phases = [xp[:, a::2, c::2, :] for a in range(2) for c in range(2)]
        halo = (k - 1) // 2
        co_max = (k - 1) // 2

    dw_w, dw_b = dw_wb
    w1, b1, w2, b2 = se_params
    cse = w1.shape[1]

    th = _largest_divisor_leq(Ho, max(1, target_pos // max(Wo, 1)))
    n_t = Ho // th
    sh = th + halo
    need_rows = (n_t - 1) * th + sh
    need_cols = co_max + Wo
    w8 = _round_up(max(phases[0].shape[2], need_cols), 8)

    # Pre-slice overlapping halo'd row strips so BlockSpec can double-buffer them:
    # one (sh, w8, caug) strip per (batch, row tile).
    strips = []
    for arr in phases:
        r, c = arr.shape[1], arr.shape[2]
        arr = jnp.pad(arr, ((0, 0), (0, max(0, need_rows - r)), (0, w8 - c), (0, 0)))
        tiles = jnp.stack([arr[:, i * th:i * th + sh] for i in range(n_t)], axis=1)
        strips.append(tiles.reshape(B * n_t, sh, w8, caug))

    strip_imap = lambda b, t: (b * n_t + t, 0, 0, 0)
    inputs = list(strips)
    in_specs = [pl.BlockSpec((1, sh, w8, caug), strip_imap) for _ in range(n_phase)]
    if has_expand:
        inputs.append(we_aug)
        in_specs.append(pl.BlockSpec((caug, cexp), lambda b, t: (0, 0)))
    inputs += [dw_w.astype(jnp.float32).reshape(k * k, 1, 1, cexp),
               dw_b.reshape(1, 1, cexp).astype(jnp.float32),
               w1.astype(jnp.bfloat16),
               b1.reshape(1, cse).astype(jnp.float32),
               w2.astype(jnp.bfloat16),
               b2.reshape(1, cexp).astype(jnp.float32)]
    in_specs += [pl.BlockSpec((k * k, 1, 1, cexp), lambda b, t: (0, 0, 0, 0)),
                 pl.BlockSpec((1, 1, cexp), lambda b, t: (0, 0, 0)),
                 pl.BlockSpec((cexp, cse), lambda b, t: (0, 0)),
                 pl.BlockSpec((1, cse), lambda b, t: (0, 0)),
                 pl.BlockSpec((cse, cexp), lambda b, t: (0, 0)),
                 pl.BlockSpec((1, cexp), lambda b, t: (0, 0))]

    kern = functools.partial(_mbconv_front_kernel, n_phase=n_phase,
                             has_expand=has_expand, taps=taps, th=th, wo=Wo,
                             n_tiles=n_t, inv_hw=1.0 / float(Ho * Wo))
    blk_bytes = (n_phase * sh * w8 * caug * 2          # input strips (bf16)
                 + th * Wo * cexp * 2                   # output tile (bf16)
                 + sh * w8 * cexp * 4 * (k + 1)         # expanded strip + column views (f32)
                 + (caug + 2 * cse + k * k) * cexp * 4)
    h, scale = pl.pallas_call(
        kern,
        out_shape=(jax.ShapeDtypeStruct((B, Ho, Wo, cexp), jnp.bfloat16),
                   jax.ShapeDtypeStruct((B, 1, cexp), jnp.float32)),
        grid=(B, n_t),
        in_specs=in_specs,
        out_specs=(pl.BlockSpec((1, th, Wo, cexp), lambda b, t: (b, t, 0, 0)),
                   pl.BlockSpec((1, 1, cexp), lambda b, t: (b, 0, 0))),
        scratch_shapes=[pltpu.VMEM((1, cexp), jnp.float32)],
        compiler_params=pltpu.CompilerParams(
            dimension_semantics=("parallel", "arbitrary"),
            vmem_limit_bytes=_vmem_limit(blk_bytes)),
    )(*inputs)
    return h, scale


# ----------------- fused SE-scale + project 1x1 + residual ------------------

def _project_kernel(*refs, has_res):
    if has_res:
        h_ref, s_ref, w_ref, b_ref, r_ref, o_ref = refs
    else:
        h_ref, s_ref, w_ref, b_ref, o_ref = refs
        r_ref = None
    _, rt, wo, cexp = h_ref.shape
    x = h_ref[0].astype(jnp.float32) * s_ref[0]             # SE channel scale (f32)
    y = jnp.dot(x.astype(jnp.bfloat16).reshape(rt * wo, cexp), w_ref[...],
                preferred_element_type=jnp.float32) + b_ref[...]
    if r_ref is not None:
        y = y + r_ref[0].reshape(rt * wo, -1).astype(jnp.float32)   # fused residual add
    o_ref[0] = y.reshape(rt, wo, -1).astype(o_ref.dtype)


def project_block(h, scale, proj_w, proj_b, residual=None, target_pos=4096):
    B, Ho, Wo, Cexp = h.shape
    Cout = proj_w.shape[1]
    rt = _largest_divisor_leq(Ho, max(1, target_pos // max(Wo, 1)))
    n_rt = Ho // rt
    inputs = [h, scale, proj_w.astype(jnp.bfloat16),
              proj_b.reshape(1, Cout).astype(jnp.float32)]
    in_specs = [pl.BlockSpec((1, rt, Wo, Cexp), lambda t, b: (b, t, 0, 0)),
                pl.BlockSpec((1, 1, Cexp), lambda t, b: (b, 0, 0)),
                pl.BlockSpec((Cexp, Cout), lambda t, b: (0, 0)),
                pl.BlockSpec((1, Cout), lambda t, b: (0, 0))]
    if residual is not None:
        inputs.append(residual.astype(jnp.bfloat16))
        in_specs.append(pl.BlockSpec((1, rt, Wo, Cout), lambda t, b: (b, t, 0, 0)))
    blk = rt * Wo * (Cexp + 2 * Cout) * 2 + Cexp * Cout * 2
    out = pl.pallas_call(
        functools.partial(_project_kernel, has_res=residual is not None),
        out_shape=jax.ShapeDtypeStruct((B, Ho, Wo, Cout), jnp.bfloat16),
        grid=(n_rt, B),
        in_specs=in_specs,
        out_specs=pl.BlockSpec((1, rt, Wo, Cout), lambda t, b: (b, t, 0, 0)),
        compiler_params=pltpu.CompilerParams(
            dimension_semantics=("parallel", "parallel"),
            vmem_limit_bytes=_vmem_limit(blk)),
    )(*inputs)
    return out


# --------------- fused head 1x1 conv + global pool + decoder MLP ------------

def _head_pool_decoder_kernel(x_ref, wh_ref, bh_ref, w1_ref, b1_ref, w2_ref,
                              b2_ref, w3_ref, b3_ref, o_ref, acc_ref,
                              *, hw_true, tile_hw, n_tiles):
    t = pl.program_id(1)

    @pl.when(t == 0)
    def _():
        acc_ref[...] = jnp.zeros_like(acc_ref)

    y = jnp.dot(x_ref[0], wh_ref[...],
                preferred_element_type=jnp.float32) + bh_ref[...]
    y = y * jax.nn.sigmoid(y)                                # head SiLU
    if tile_hw * n_tiles != hw_true:                         # mask zero-padded rows
        rows = t * tile_hw + jax.lax.broadcasted_iota(jnp.int32, (tile_hw, 1), 0)
        y = jnp.where(rows < hw_true, y, 0.0)
    acc_ref[...] += jnp.sum(y, axis=0, keepdims=True)        # (1, 1280)

    @pl.when(t == n_tiles - 1)
    def _():
        pooled = acc_ref[...] * (1.0 / hw_true)              # adaptive avg pool (1x1)
        h = jnp.dot(pooled.astype(jnp.bfloat16), w1_ref[...],
                    preferred_element_type=jnp.float32) + b1_ref[...]
        h = jnp.maximum(h, 0.0)
        h = jnp.dot(h.astype(jnp.bfloat16), w2_ref[...],
                    preferred_element_type=jnp.float32) + b2_ref[...]
        h = jnp.maximum(h, 0.0)
        out = jnp.dot(h.astype(jnp.bfloat16), w3_ref[...],
                      preferred_element_type=jnp.float32) + b3_ref[...]
        o_ref[0] = out.astype(o_ref.dtype)


def head_pool_decoder(x_bhwc, head_w, head_b, dec, tile_hw=1024):
    """Fused head 1x1 conv + global avg pool + decoder MLP (dropout == identity)."""
    B, H, W, Cin = x_bhwc.shape
    HW = H * W
    (w1, b1), (w2, b2), (w3, b3) = dec
    nf = head_w.shape[1]
    d1, d2, nc = w1.shape[1], w2.shape[1], w3.shape[1]
    th = HW if HW <= tile_hw else tile_hw
    HWp = _round_up(HW, th)
    n_t = HWp // th
    x = x_bhwc.reshape(B, HW, Cin).astype(jnp.bfloat16)
    if HWp != HW:
        x = jnp.pad(x, ((0, 0), (0, HWp - HW), (0, 0)))
    kern = functools.partial(_head_pool_decoder_kernel, hw_true=HW, tile_hw=th,
                             n_tiles=n_t)
    blk = th * (Cin + nf) * 2 + (Cin * nf + nf * d1 + d1 * d2 + d2 * nc) * 2
    out = pl.pallas_call(
        kern,
        out_shape=jax.ShapeDtypeStruct((B, 1, nc), jnp.float32),
        grid=(B, n_t),
        in_specs=[pl.BlockSpec((1, th, Cin), lambda b, t: (b, t, 0)),
                  pl.BlockSpec((Cin, nf), lambda b, t: (0, 0)),
                  pl.BlockSpec((1, nf), lambda b, t: (0, 0)),
                  pl.BlockSpec((nf, d1), lambda b, t: (0, 0)),
                  pl.BlockSpec((1, d1), lambda b, t: (0, 0)),
                  pl.BlockSpec((d1, d2), lambda b, t: (0, 0)),
                  pl.BlockSpec((1, d2), lambda b, t: (0, 0)),
                  pl.BlockSpec((d2, nc), lambda b, t: (0, 0)),
                  pl.BlockSpec((1, nc), lambda b, t: (0, 0))],
        out_specs=pl.BlockSpec((1, 1, nc), lambda b, t: (b, 0, 0)),
        scratch_shapes=[pltpu.VMEM((1, nf), jnp.float32)],
        compiler_params=pltpu.CompilerParams(
            dimension_semantics=("parallel", "arbitrary"),
            vmem_limit_bytes=_vmem_limit(blk)),
    )(x, head_w.astype(jnp.bfloat16), head_b.reshape(1, nf).astype(jnp.float32),
      w1.astype(jnp.bfloat16), b1.reshape(1, d1).astype(jnp.float32),
      w2.astype(jnp.bfloat16), b2.reshape(1, d2).astype(jnp.float32),
      w3.astype(jnp.bfloat16), b3.reshape(1, nc).astype(jnp.float32))
    return out.reshape(B, nc)


# ------------------------- deterministic parameters -------------------------

class KeyGen:
    def __init__(self, seed):
        self._key = jax.random.PRNGKey(seed)

    def __call__(self):
        self._key, k = jax.random.split(self._key)
        return k


def _init_conv(kg, k, cin, cout):
    fan_in = k * k * cin
    return jax.random.normal(kg(), (k * k * cin, cout), jnp.float32) / jnp.sqrt(fan_in)


def _init_dwconv(kg, k, c):
    return jax.random.normal(kg(), (k * k, c), jnp.float32) / jnp.sqrt(k * k)


def _init_bn(kg, c):
    gamma = 1.0 + 0.1 * jax.random.normal(kg(), (c,), jnp.float32)
    beta = 0.1 * jax.random.normal(kg(), (c,), jnp.float32)
    mean = 0.1 * jax.random.normal(kg(), (c,), jnp.float32)
    var = jnp.abs(1.0 + 0.1 * jax.random.normal(kg(), (c,), jnp.float32))
    return gamma, beta, mean, var


def _fold_bn(w, bn):
    """Fold eval-mode BatchNorm into the preceding (bias-free) conv weight."""
    gamma, beta, mean, var = bn
    scale = gamma / jnp.sqrt(var + EPS)
    return (w * scale).astype(jnp.bfloat16), (beta - mean * scale).astype(jnp.float32)


def _init_linear(kg, cin, cout):
    w = jax.random.normal(kg(), (cin, cout), jnp.float32) / jnp.sqrt(cin)
    b = 0.01 * jax.random.normal(kg(), (cout,), jnp.float32)
    return w.astype(jnp.bfloat16), b


# EfficientNet-B0 MBConv configuration:
# (expand_ratio, kernel, stride, in_ch, out_ch, num_layers)
MBCONV_CONFIGS = [
    (1, 3, 1, 32, 16, 1),
    (6, 3, 2, 16, 24, 2),
    (6, 5, 2, 24, 40, 2),
    (6, 3, 2, 40, 80, 3),
    (6, 5, 1, 80, 112, 3),
    (6, 5, 2, 112, 192, 4),
    (6, 3, 1, 192, 320, 1),
]
N_FEATURES = 1280


def init_params(kg, n_classes):
    params = {}
    params["stem"] = _fold_bn(_init_conv(kg, 3, 3, 32), _init_bn(kg, 32))

    blocks = []
    for (er, k, s, cin, cout, n) in MBCONV_CONFIGS:
        for i in range(n):
            bin_ch = cin if i == 0 else cout
            stride = s if i == 0 else 1
            exp = bin_ch * er
            blk = {"k": k, "s": stride, "cin": bin_ch, "cout": cout}
            if er != 1:
                blk["expand"] = _fold_bn(_init_conv(kg, 1, bin_ch, exp),
                                         _init_bn(kg, exp))
            blk["dw"] = _fold_bn(_init_dwconv(kg, k, exp), _init_bn(kg, exp))
            cse = max(1, bin_ch // 4)
            w1, b1 = _init_linear(kg, exp, cse)
            w2, b2 = _init_linear(kg, cse, exp)
            blk["se"] = (w1, b1, w2, b2)
            blk["project"] = _fold_bn(_init_conv(kg, 1, exp, cout),
                                      _init_bn(kg, cout))
            blocks.append(blk)
    params["blocks"] = blocks

    params["head"] = _fold_bn(_init_conv(kg, 1, 320, N_FEATURES),
                              _init_bn(kg, N_FEATURES))
    params["dec"] = (_init_linear(kg, N_FEATURES, 128),
                     _init_linear(kg, 128, 64),
                     _init_linear(kg, 64, n_classes))
    return params


# ------------------------------- forward ------------------------------------

def encoder_decoder_forward(params, x_nchw):
    # NCHW -> NHWC (kernel layout), bf16 data path.
    x = jnp.transpose(x_nchw, (0, 2, 3, 1)).astype(jnp.bfloat16)

    # Encoder stem: conv3x3/s2 + folded BN + SiLU.
    w, b = params["stem"]
    x = conv2d_bn_act(x, w, b, k=3, s=2, act="silu")

    # Encoder: MBConv blocks. Each block = one fused expand+dw+SE kernel + one
    # fused (SE scale + project 1x1 + residual) kernel.
    for blk in params["blocks"]:
        inp = x
        h, scale = mbconv_front(x, blk.get("expand"), blk["dw"], blk["se"],
                                k=blk["k"], s=blk["s"])
        # stochastic depth == identity in eval; residual fused into the project conv.
        res = inp if (blk["s"] == 1 and blk["cin"] == blk["cout"]) else None
        w, b = blk["project"]
        x = project_block(h, scale, w, b, residual=res)

    # Encoder head (1x1 conv to 1280 + SiLU) + global avg pool + decoder MLP.
    w, b = params["head"]
    logits = head_pool_decoder(x, w, b, params["dec"])
    return logits


# --------------------------------- main --------------------------------------

if __name__ == "__main__":
    B = 2
    resolution = 32              # module default is 256; small for the test
    classes = sorted(["hat", "head", "torso", "legs", "accessory"])  # 5 classes

    params = init_params(KeyGen(1), len(classes))

    x = jax.random.normal(jax.random.PRNGKey(0),
                          (B, 3, resolution, resolution), jnp.float32)

    logits = encoder_decoder_forward(params, x)
    logits = jax.block_until_ready(logits)

    assert logits.shape == (B, len(classes)), logits.shape
    print("KERNEL_OK")
</pallas_src>

<mosaic_0001>
module attributes {stable_mosaic.version = 11 : i64} {
  func.func @_matmul_bias_act_kernel(%arg0: i32, %arg1: memref<512x27xbf16, #tpu.memory_space<vmem>>, %arg2: memref<27x32xbf16, #tpu.memory_space<vmem>>, %arg3: memref<1x32xf32, #tpu.memory_space<vmem>>, %arg4: memref<512x32xbf16, #tpu.memory_space<vmem>>) attributes {dimension_semantics = [#tpu.dimension_semantics<parallel>], iteration_bounds = array<i64: 1>, scalar_prefetch = 0 : i64, scratch_operands = 0 : i64, tpu.core_type = #tpu.core_type<tc>, window_params = [{transform_indices = @transform_0, window_bounds = array<i64: 512, 27>}, {pipeline_mode = #tpu.pipeline_mode<synchronous>, transform_indices = @transform_1, window_bounds = array<i64: 27, 32>}, {pipeline_mode = #tpu.pipeline_mode<synchronous>, transform_indices = @transform_2, window_bounds = array<i64: 1, 32>}, {transform_indices = @transform_3, window_bounds = array<i64: 512, 32>}]} {
    %c0 = arith.constant 0 : index
    %c0_0 = arith.constant 0 : index
    %0 = vector.load %arg1[%c0, %c0_0] : memref<512x27xbf16, #tpu.memory_space<vmem>>, vector<512x27xbf16>
    %c0_1 = arith.constant 0 : index
    %c0_2 = arith.constant 0 : index
    %1 = vector.load %arg2[%c0_1, %c0_2] : memref<27x32xbf16, #tpu.memory_space<vmem>>, vector<27x32xbf16>
    %cst = arith.constant dense<0.000000e+00> : vector<512x32xf32>
    %2 = tpu.matmul %0, %1, %cst {dimension_numbers = #tpu.dot_dimension_numbers<[1], [0], [0], [1], [0, 0, 1, 1], [], []>} : vector<512x27xbf16>, vector<27x32xbf16>, vector<512x32xf32> -> vector<512x32xf32>
    %c0_3 = arith.constant 0 : index
    %c0_4 = arith.constant 0 : index
    %3 = vector.load %arg3[%c0_3, %c0_4] : memref<1x32xf32, #tpu.memory_space<vmem>>, vector<1x32xf32>
    %4 = vector.broadcast %3 : vector<1x32xf32> to vector<512x32xf32>
    %5 = arith.addf %2, %4 : vector<512x32xf32>
    %6 = arith.negf %5 : vector<512x32xf32>
    %7 = math.exp %6 : vector<512x32xf32>
    %cst_5 = arith.constant 1.000000e+00 : f32
    %8 = vector.broadcast %cst_5 : f32 to vector<512x32xf32>
    %9 = arith.addf %8, %7 : vector<512x32xf32>
    %10 = arith.divf %8, %9 : vector<512x32xf32>
    %11 = arith.mulf %5, %10 : vector<512x32xf32>
    %12 = arith.truncf %11 : vector<512x32xf32> to vector<512x32xbf16>
    %c0_6 = arith.constant 0 : index
    %c0_7 = arith.constant 0 : index
    %13 = vector.load %arg4[%c0_6, %c0_7] : memref<512x32xbf16, #tpu.memory_space<vmem>>, vector<512x32xbf16>
    tpu.vector_store %arg4[%c0_6, %c0_7], %12 {strides = array<i32>} : memref<512x32xbf16, #tpu.memory_space<vmem>>, vector<512x32xbf16>,
    return
  }
  func.func @transform_0(%arg0: i32) -> (i32, i32) {
    %c0_i32 = arith.constant 0 : i32
    %c0_i32_0 = arith.constant 0 : i32
    return %arg0, %c0_i32 : i32, i32
  }
  func.func @transform_1(%arg0: i32) -> (i32, i32) {
    %c0_i32 = arith.constant 0 : i32
    %c0_i32_0 = arith.constant 0 : i32
    %c0_i32_1 = arith.constant 0 : i32
    return %c0_i32, %c0_i32_0 : i32, i32
  }
  func.func @transform_2(%arg0: i32) -> (i32, i32) {
    %c0_i32 = arith.constant 0 : i32
    %c0_i32_0 = arith.constant 0 : i32
    %c0_i32_1 = arith.constant 0 : i32
    return %c0_i32, %c0_i32_0 : i32, i32
  }
  func.func @transform_3(%arg0: i32) -> (i32, i32) {
    %c0_i32 = arith.constant 0 : i32
    %c0_i32_0 = arith.constant 0 : i32
    return %arg0, %c0_i32 : i32, i32
  }
}

</mosaic_0001>

<bundles_post_ra>
// kernel: tpu_custom_call.1
= control target key start
LH: loop header
LB: loop body
LE: loop exit
PB: predicated region body
PF: predicated region fallthrough
CT: control target
= control target key end

     0   :  { %vm358_vm0 = vcmask 1044480   ;;  %vm359_vm1 = vcmask 1045504   ;;  %vm261_vm2 = vcmask 220160   ;;  %v2084_v1 = vmov 65535   ;;  %s2931_s1 = inlined_call_operand.vmem [shape: bf16[27,32], index: 1, kind: input, shape index: {}]   ;;  %s2932_s0 = inlined_call_operand.vmem [shape: bf16[512,27], index: 0, kind: input, shape index: {}]   ;;  %s2933_s2 = inlined_call_operand.vmem [shape: f32[1,32], index: 2, kind: input, shape index: {}]   ;;  %s2934_s3 = inlined_call_operand.vmem [shape: bf16[512,32], index: 3, kind: output, shape index: {}]  }
   0x1   :  { %v1793_v0 = vld [vmem:[%s2931_s1] sm:$0xff]   ;;  %v360_v2 = vsel %vm358_vm0, 4294967295, %v2084_v1  ;;  %v1794_v3 = vld [vmem:[%s2931_s1 + $0x8] sm:$0x3f]   ;;  %v1799_v10 = vld [vmem:[%s2932_s0 + $0x10] sm:$0xff]   ;;  %vm1358_vm3 = vcmask 257024  }
   0x2   :  { %1720 = vmatprep.subr.bf16.mxu0 %v1793_v0  ;;  %1788 = vmatprep.subr.bf16.mxu1 %v1793_v0  ;;  %v361_v4 = vsel %vm359_vm1, %v360_v2, 0  ;;  %v1795_v5 = vld [vmem:[%s2932_s0] sm:$0xff]   ;;  %v1797_v8 = vld [vmem:[%s2932_s0 + $0x8] sm:$0xff]   ;;  %v1800_v11 = vld [vmem:[%s2932_s0 + $0x90] sm:$0xff]  }
   0x3   :  { %1721 = vmatpush3.bf16.msra.mxu0 %v1793_v0  ;;  %1790 = vmatpush3.bf16.msra.mxu1 %v1793_v0  ;;  %v363_v6 = vand.u32 %v1794_v3, %v361_v4  ;;  %v1796_v7 = vld [vmem:[%s2932_s0 + $0x80] sm:$0xff]   ;;  %v1798_v9 = vld [vmem:[%s2932_s0 + $0x88] sm:$0xff]   ;;  %v1801_v12 = vld [vmem:[%s2932_s0 + $0x18] sm:$0xff]  }
   0x4   :  { %1724 = vmatprep.mubr.msk.bf16.mxu0 %vm261_vm2, %v1795_v5  ;;  %1756 = vmatprep.mubr.msk.bf16.mxu1 %vm261_vm2, %v1796_v7  ;;  %v1802_v13 = vld [vmem:[%s2932_s0 + $0x98] sm:$0xff]   ;;  %v1803_v14 = vld [vmem:[%s2932_s0 + $0x20] sm:$0xff]   ;;  %v1805_v16 = vld [vmem:[%s2932_s0 + $0x28] sm:$0xff]  }
   0x5   :  { %1722 = vmatprep.subr.bf16.mxu0 %v363_v6  ;;  %1789 = vmatprep.subr.bf16.mxu1 %v363_v6  ;;  %v1804_v15 = vld [vmem:[%s2932_s0 + $0xa0] sm:$0xff]   ;;  %v1806_v17 = vld [vmem:[%s2932_s0 + $0xa8] sm:$0xff]   ;;  %v1807_v18 = vld [vmem:[%s2932_s0 + $0x30] sm:$0xff]  }
   0x6   :  { %v1808_v19 = vld [vmem:[%s2932_s0 + $0xb0] sm:$0xff]   ;;  %v1809_v20 = vld [vmem:[%s2932_s0 + $0x38] sm:$0xff]   ;;  %v1811_v22 = vld [vmem:[%s2932_s0 + $0x40] sm:$0xff]  }
   0x7   :  { %1723 = vmatpush3.bf16.msra.mxu0 %v363_v6  ;;  %1791 = vmatpush3.bf16.msra.mxu1 %v363_v6  ;;  %v1810_v21 = vld [vmem:[%s2932_s0 + $0xb8] sm:$0xff]   ;;  %v1812_v23 = vld [vmem:[%s2932_s0 + $0xc0] sm:$0xff]   ;;  %v1813_v24 = vld [vmem:[%s2932_s0 + $0x48] sm:$0xff]  }
   0x8   :  { %v1814_v25 = vld [vmem:[%s2932_s0 + $0xc8] sm:$0xff]   ;;  %v1815_v26 = vld [vmem:[%s2932_s0 + $0x50] sm:$0xff]   ;;  %v1817_v28 = vld [vmem:[%s2932_s0 + $0x58] sm:$0xff]  }
   0x9   :  { %v1816_v27 = vld [vmem:[%s2932_s0 + $0xd0] sm:$0xff]   ;;  %v1818_v29 = vld [vmem:[%s2932_s0 + $0xd8] sm:$0xff]   ;;  %v1819_v30 = vld [vmem:[%s2932_s0 + $0x60] sm:$0xff]  }
   0xa   :  { %1725 = vmatmul.mubr.msk.bf16.vlgmr.msra.gmra.mrb[0].mxu0 %vm261_vm2, %v1797_v8  ;;  %1757 = vmatmul.mubr.msk.bf16.vlgmr.msra.gmra.mrb[0].mxu1 %vm261_vm2, %v1798_v9  ;;  %v1820_v31 = vld [vmem:[%s2932_s0 + $0xe0] sm:$0xff]   ;;  %v1821_v32 = vld [vmem:[%s2932_s0 + $0x68] sm:$0xff]   ;;  %v1823_v34 = vld [vmem:[%s2932_s0 + $0x70] sm:$0xff]  }
   0xb   :  { %1728 = vmatprep.mubr.msk.bf16.mxu0 %vm261_vm2, %v1799_v10  ;;  %1760 = vmatprep.mubr.msk.bf16.mxu1 %vm261_vm2, %v1800_v11  ;;  %v1822_v33 = vld [vmem:[%s2932_s0 + $0xe8] sm:$0xff]   ;;  %v1824_v35 = vld [vmem:[%s2932_s0 + $0xf0] sm:$0xff]   ;;  %v1825_v36 = vld [vmem:[%s2932_s0 + $0x78] sm:$0xff]  }
   0xc   :  { %v1826_v37 = vld [vmem:[%s2932_s0 + $0xf8] sm:$0xff]   ;;  %v2242_v38 = vld [vmem:[%s2933_s2] ss:$0 sm:$0xff] }
  0x12   :  { %1729 = vmatmul.mubr.msk.bf16.gmra.mrb[4].mxu0 %vm261_vm2, %v1801_v12  ;;  %1761 = vmatmul.mubr.msk.bf16.gmra.mrb[4].mxu1 %vm261_vm2, %v1802_v13 }
  0x13   :  { %1732 = vmatprep.mubr.msk.bf16.mxu0 %vm261_vm2, %v1803_v14  ;;  %1764 = vmatprep.mubr.msk.bf16.mxu1 %vm261_vm2, %v1804_v15 }
  0x1a   :  { %1733 = vmatmul.mubr.msk.bf16.gmra.mrb[8].mxu0 %vm261_vm2, %v1805_v16  ;;  %1765 = vmatmul.mubr.msk.bf16.gmra.mrb[8].mxu1 %vm261_vm2, %v1806_v17 }
  0x1b   :  { %1736 = vmatprep.mubr.msk.bf16.mxu0 %vm261_vm2, %v1807_v18  ;;  %1768 = vmatprep.mubr.msk.bf16.mxu1 %vm261_vm2, %v1808_v19 }
  0x22   :  { %1737 = vmatmul.mubr.msk.bf16.gmra.mrb[12].mxu0 %vm261_vm2, %v1809_v20  ;;  %1769 = vmatmul.mubr.msk.bf16.gmra.mrb[12].mxu1 %vm261_vm2, %v1810_v21 }
  0x23   :  { %1740 = vmatprep.mubr.msk.bf16.mxu0 %vm261_vm2, %v1811_v22  ;;  %1772 = vmatprep.mubr.msk.bf16.mxu1 %vm261_vm2, %v1812_v23 }
  0x2a   :  { %1741 = vmatmul.mubr.msk.bf16.gmra.mrb[16].mxu0 %vm261_vm2, %v1813_v24  ;;  %1773 = vmatmul.mubr.msk.bf16.gmra.mrb[16].mxu1 %vm261_vm2, %v1814_v25 }
  0x2b   :  { %1744 = vmatprep.mubr.msk.bf16.mxu0 %vm261_vm2, %v1815_v26  ;;  %1776 = vmatprep.mubr.msk.bf16.mxu1 %vm261_vm2, %v1816_v27 }
  0x32   :  { %1745 = vmatmul.mubr.msk.bf16.gmra.mrb[20].mxu0 %vm261_vm2, %v1817_v28  ;;  %1777 = vmatmul.mubr.msk.bf16.gmra.mrb[20].mxu1 %vm261_vm2, %v1818_v29 }
  0x33   :  { %1748 = vmatprep.mubr.msk.bf16.mxu0 %vm261_vm2, %v1819_v30  ;;  %1780 = vmatprep.mubr.msk.bf16.mxu1 %vm261_vm2, %v1820_v31 }
  0x3a   :  { %1749 = vmatmul.mubr.msk.bf16.gmra.mrb[24].mxu0 %vm261_vm2, %v1821_v32  ;;  %1781 = vmatmul.mubr.msk.bf16.gmra.mrb[24].mxu1 %vm261_vm2, %v1822_v33 }
  0x3b   :  { %1752 = vmatprep.mubr.msk.bf16.mxu0 %vm261_vm2, %v1823_v34  ;;  %1784 = vmatprep.mubr.msk.bf16.mxu1 %vm261_vm2, %v1824_v35 }
  0x42   :  { %1753 = vmatmul.mubr.msk.bf16.gmra.mrb[28].mxu0 %vm261_vm2, %v1825_v36  ;;  %1785 = vmatmul.mubr.msk.bf16.gmra.mrb[28].mxu1 %vm261_vm2, %v1826_v37 }
  0xdd   :  { %v1726_v39 = vpop.f32.mrb[0].mxu0  ;;  %v1758_v40 = vpop.f32.mrb[0].mxu1 }
  0xde   :  { %v2245_v41 = vadd.f32 %v1726_v39, %v2242_v38  ;;  %v2248_v42 = vadd.f32 %v1758_v40, %v2242_v38  ;;  %v399_v43 = vpop.f32.mrb[1].mxu0  ;;  %v527_v44 = vpop.f32.mrb[1].mxu1 }
  0xdf   :  { %v2251_v45 = vadd.f32 %v2242_v38, %v399_v43  ;;  %v2254_v46 = vadd.f32 %v2242_v38, %v527_v44  ;;  %v1727_v47 = vpop.f32.mrb[2].mxu0  ;;  %v1759_v48 = vpop.f32.mrb[2].mxu1 }
  0xe0   :  { %v1496_v49 = vmul.f32 -1.442695, %v2245_v41  ;;  %v1528_v50 = vmul.f32 -1.442695, %v2248_v42  ;;  %v2259_v51 = vadd.f32 %v1727_v47, %v2242_v38  ;;  %v2262_v52 = vadd.f32 %v1759_v48, %v2242_v38  ;;  %v402_v53 = vpop.f32.mrb[3].mxu0  ;;  %v530_v54 = vpop.f32.mrb[3].mxu1 }
  0xe1   :  { %v1494_v55 = vmul.f32 -1.442695, %v2251_v45  ;;  %v1526_v56 = vmul.f32 -1.442695, %v2254_v46  ;;  %v2267_v57 = vadd.f32 %v2242_v38, %v402_v53  ;;  %v2270_v58 = vadd.f32 %v2242_v38, %v530_v54 }
  0xe2   :  { %1827 = vpow2.f32 %v1496_v49  ;;  %v1497_v59 = vmul.f32 -1.442695, %v2259_v51  ;;  %v1529_v60 = vmul.f32 -1.442695, %v2262_v52 }
  0xe3   :  { %1829 = vpow2.f32 %v1528_v50  ;;  %v1495_v61 = vmul.f32 -1.442695, %v2267_v57  ;;  %v1527_v62 = vmul.f32 -1.442695, %v2270_v58 }
  0xe4   :  { %1831 = vpow2.f32 %v1494_v55 }
  0xe5   :  { %1833 = vpow2.f32 %v1526_v56  ;;  %v1730_v63 = vpop.f32.mrb[4].mxu0  ;;  %v1762_v0 = vpop.f32.mrb[4].mxu1 }
  0xe6   :  { %1835 = vpow2.f32 %v1497_v59  ;;  %v2277_v1 = vadd.f32 %v1730_v63, %v2242_v38  ;;  %v2280_v2 = vadd.f32 %v1762_v0, %v2242_v38  ;;  %v415_v3 = vpop.f32.mrb[5].mxu0  ;;  %v543_v4 = vpop.f32.mrb[5].mxu1 }
  0xe7   :  { %1837 = vpow2.f32 %v1529_v60  ;;  %v2283_v5 = vadd.f32 %v2242_v38, %v415_v3  ;;  %v2286_v6 = vadd.f32 %v2242_v38, %v543_v4  ;;  %v1731_v7 = vpop.f32.mrb[6].mxu0  ;;  %v1763_v8 = vpop.f32.mrb[6].mxu1 }
  0xe8   :  { %1839 = vpow2.f32 %v1495_v61  ;;  %v1500_v9 = vmul.f32 -1.442695, %v2277_v1  ;;  %v1532_v10 = vmul.f32 -1.442695, %v2280_v2  ;;  %v2291_v11 = vadd.f32 %v1731_v7, %v2242_v38  ;;  %v418_v12 = vpop.f32.mrb[7].mxu0  ;;  %v546_v13 = vpop.f32.mrb[7].mxu1 }
  0xe9   :  { %1841 = vpow2.f32 %v1527_v62  ;;  %v1498_v14 = vmul.f32 -1.442695, %v2283_v5  ;;  %v1530_v15 = vmul.f32 -1.442695, %v2286_v6  ;;  %v2297_v35 = vadd.f32 %v1763_v8, %v2242_v38 }
  0xea   :  { %1843 = vpow2.f32 %v1500_v9  ;;  %v1501_v16 = vmul.f32 -1.442695, %v2291_v11  ;;  %v2300_v40 = vadd.f32 %v2242_v38, %v418_v12  ;;  %v2303_v47 = vadd.f32 %v2242_v38, %v546_v13 }
  0xeb   :  { %1845 = vpow2.f32 %v1532_v10  ;;  %v1533_v55 = vmul.f32 -1.442695, %v2297_v35 }
  0xec   :  { %v1828_v17 = vpop.eup %1827  ;;  %1847 = vpow2.f32 %v1498_v14  ;;  %v1499_v62 = vmul.f32 -1.442695, %v2300_v40  ;;  %v1531_v8 = vmul.f32 -1.442695, %v2303_v47 }
  0xed   :  { %v1830_v18 = vpop.eup %1829  ;;  %v848_v19 = vadd.f32 1.0, %v1828_v17  ;;  %1849 = vpow2.f32 %v1530_v15  ;;  %v1734_v20 = vpop.f32.mrb[8].mxu0 }
  0xee   :  { %v1766_v21 = vpop.f32.mrb[8].mxu1  ;;  %v1832_v22 = vpop.eup %1831  ;;  %v880_v23 = vadd.f32 1.0, %v1830_v18  ;;  %1851 = vpow2.f32 %v1501_v16  ;;  %v2306_v50 = vadd.f32 %v1734_v20, %v2242_v38 }
  0xef   :  { %v431_v24 = vpop.f32.mrb[9].mxu0  ;;  %v559_v25 = vpop.f32.mrb[9].mxu1  ;;  %1853 = vrcp.f32 %v848_v19  ;;  %v846_v27 = vadd.f32 1.0, %v1832_v22  ;;  %v2310_v56 = vadd.f32 %v1766_v21, %v2242_v38 }
  0xf0   :  { %v1834_v26 = vpop.eup %1833  ;;  %v1735_v28 = vpop.f32.mrb[10].mxu0  ;;  %1855 = vrcp.f32 %v880_v23  ;;  %v2316_v63 = vadd.f32 %v2242_v38, %v431_v24  ;;  %v2324_v9 = vadd.f32 %v2242_v38, %v559_v25  ;;  %v1504_v15 = vmul.f32 -1.442695, %v2306_v50 }
  0xf1   :  { %v1767_v29 = vpop.f32.mrb[10].mxu1  ;;  %v1836_v30 = vpop.eup %1835  ;;  %v878_v31 = vadd.f32 1.0, %v1834_v26  ;;  %1857 = vrcp.f32 %v846_v27  ;;  %v1536_v20 = vmul.f32 -1.442695, %v2310_v56  ;;  %v2337_v21 = vadd.f32 %v1735_v28, %v2242_v38 }
  0xf2   :  { %v434_v32 = vpop.f32.mrb[11].mxu0  ;;  %v1838_v33 = vpop.eup %1837  ;;  %v849_v34 = vadd.f32 1.0, %v1836_v30  ;;  %v1502_v25 = vmul.f32 -1.442695, %v2316_v63  ;;  %v2344_v26 = vadd.f32 %v1767_v29, %v2242_v38 }
  0xf3   :  { %v562_v36 = vpop.f32.mrb[11].mxu1  ;;  %v1840_v37 = vpop.eup %1839  ;;  %1859 = vrcp.f32 %v878_v31  ;;  %v881_v39 = vadd.f32 1.0, %v1838_v33  ;;  %v1534_v31 = vmul.f32 -1.442695, %v2324_v9  ;;  %v2349_v28 = vadd.f32 %v2242_v38, %v434_v32 }
  0xf4   :  { %v1842_v43 = vpop.eup %1841  ;;  %1861 = vrcp.f32 %v849_v34  ;;  %v847_v44 = vadd.f32 1.0, %v1840_v37 }
  0xf5   :  { %v1844_v48 = vpop.eup %1843  ;;  %1863 = vrcp.f32 %v881_v39  ;;  %v879_v49 = vadd.f32 1.0, %v1842_v43  ;;  %v2312_v59 = vpop.f32.mrb[12].mxu0 }
  0xf6   :  { %v1846_v53 = vpop.eup %1845  ;;  %1865 = vrcp.f32 %v847_v44  ;;  %v852_v54 = vadd.f32 1.0, %v1844_v48  ;;  %v2318_v0 = vpop.f32.mrb[12].mxu1 }
  0xf7   :  { %v1848_v60 = vpop.eup %1847  ;;  %1867 = vrcp.f32 %v879_v49  ;;  %v884_v61 = vadd.f32 1.0, %v1846_v53  ;;  %v2320_v3 = vpop.f32.mrb[13].mxu0  ;;  %v1537_v49 = vmul.f32 -1.442695, %v2344_v26 }
  0xf8   :  { %v1850_v4 = vpop.eup %1849  ;;  %1869 = vrcp.f32 %v852_v54  ;;  %v850_v7 = vadd.f32 1.0, %v1848_v60  ;;  %v2326_v10 = vpop.f32.mrb[13].mxu1 }
  0xf9   :  { %v2328_v12 = vpop.f32.mrb[14].mxu0  ;;  %v1852_v13 = vpop.eup %1851  ;;  %1871 = vrcp.f32 %v884_v61  ;;  %v882_v14 = vadd.f32 1.0, %v1850_v4 }
  0xfa   :  { %v2331_v16 = vpop.f32.mrb[14].mxu1  ;;  %v2333_v17 = vpop.f32.mrb[15].mxu0  ;;  %1873 = vrcp.f32 %v850_v7  ;;  %v853_v19 = vadd.f32 1.0, %v1852_v13 }
  0xfb   :  { %v1854_v18 = vpop.eup %1853  ;;  %v2339_v22 = vpop.f32.mrb[15].mxu1  ;;  %1875 = vrcp.f32 %v882_v14 }
  0xfc   :  { %v1856_v23 = vpop.eup %1855  ;;  %v1040_v24 = vmul.f32 %v1854_v18, %v2245_v41  ;;  %1877 = vrcp.f32 %v853_v19  ;;  %v2353_v41 = vadd.f32 %v2242_v38, %v562_v36 }
  0xfd   :  { %v1858_v27 = vpop.eup %1857  ;;  %v1072_v30 = vmul.f32 %v1856_v23, %v2248_v42  ;;  %1879 = vpow2.f32 %v1533_v55  ;;  %v1505_v42 = vmul.f32 -1.442695, %v2337_v21  ;;  %v2357_v44 = vpop.f32.mrb[16].mxu0 }
  0xfe   :  { %v1860_v33 = vpop.eup %1859  ;;  %v1624_v34 = vpack.c.bf16 %v1040_v24, %v1040_v24  ;;  %v1038_v37 = vmul.f32 %v1858_v27, %v2251_v45  ;;  %1881 = vpow2.f32 %v1499_v62  ;;  %v2359_v48 = vpop.f32.mrb[16].mxu1  ;;  %v1535_v23 = vmul.f32 -1.442695, %v2353_v41 }
  0xff   :  { %v1862_v39 = vpop.eup %1861  ;;  %v1656_v29 = vpack.c.bf16 %v1072_v30, %v1072_v30  ;;  %v1070_v43 = vmul.f32 %v1860_v33, %v2254_v46  ;;  %1883 = vpow2.f32 %v1531_v8  ;;  %v2367_v46 = vpop.f32.mrb[17].mxu0 }
 0x100   :  { %v1864_v32 = vpop.eup %1863  ;;  %1361 = vst.msk [vmem:[%s2934_s3 + $0x8] sm:$0xf] %vm1358_vm3, %v1624_v34  ;;  %v1622_v45 = vpack.c.bf16 %v1038_v37, %v1038_v37  ;;  %v1041_v36 = vmul.f32 %v1862_v39, %v2259_v51  ;;  %v2369_v53 = vpop.f32.mrb[17].mxu1  ;;  %1885 = vpow2.f32 %v1504_v15  ;;  %v2378_v51 = vadd.f32 %v2312_v59, %v2242_v38 }
 0x101   :  { %v1866_v54 = vpop.eup %1865  ;;  %1393 = vst.msk [vmem:[%s2934_s3 + $0x88] sm:$0xf] %vm1358_vm3, %v1656_v29  ;;  %v1654_v55 = vpack.c.bf16 %v1070_v43, %v1070_v43  ;;  %v1073_v60 = vmul.f32 %v1864_v32, %v2262_v52  ;;  %v2380_v61 = vpop.f32.mrb[18].mxu0  ;;  %1887 = vpow2.f32 %v1536_v20  ;;  %v2391_v52 = vadd.f32 %v2318_v0, %v2242_v38 }
 0x102   :  { %v2382_v62 = vpop.f32.mrb[18].mxu1  ;;  %v1868_v4 = vpop.eup %1867  ;;  %1359 = vst.msk [vmem:[%s2934_s3] sm:$0xf] %vm1358_vm3, %v1622_v45  ;;  %v1625_v7 = vpack.c.bf16 %v1041_v36, %v1041_v36  ;;  %v1039_v8 = vmul.f32 %v1866_v54, %v2267_v57  ;;  %1889 = vpow2.f32 %v1502_v25  ;;  %v1503_v57 = vmul.f32 -1.442695, %v2349_v28 }
 0x103   :  { %v2393_v59 = vpop.f32.mrb[19].mxu0  ;;  %v2395_v13 = vpop.f32.mrb[19].mxu1  ;;  %1391 = vst.msk [vmem:[%s2934_s3 + $0x80] sm:$0xf] %vm1358_vm3, %v1654_v55  ;;  %v1657_v15 = vpack.c.bf16 %v1073_v60, %v1073_v60  ;;  %v1071_v18 = vmul.f32 %v1868_v4, %v2270_v58  ;;  %1891 = vpow2.f32 %v1534_v31  ;;  %v1508_v27 = vmul.f32 -1.442695, %v2378_v51 }
 0x104   :  { %v1870_v14 = vpop.eup %1869  ;;  %1362 = vst.msk [vmem:[%s2934_s3 + $0xc] sm:$0xf] %vm1358_vm3, %v1625_v7  ;;  %v1623_v0 = vpack.c.bf16 %v1039_v8, %v1039_v8  ;;  %1893 = vpow2.f32 %v1505_v42  ;;  %v1540_v33 = vmul.f32 -1.442695, %v2391_v52 }
 0x105   :  { %v1872_v19 = vpop.eup %1871  ;;  %v1044_v20 = vmul.f32 %v1870_v14, %v2277_v1  ;;  %1394 = vst.msk [vmem:[%s2934_s3 + $0x8c] sm:$0xf] %vm1358_vm3, %v1657_v15  ;;  %v1655_v58 = vpack.c.bf16 %v1071_v18, %v1071_v18  ;;  %1895 = vpow2.f32 %v1537_v49  ;;  %v2426_v39 = vpop.f32.mrb[20].mxu0 }
 0x106   :  { %v1874_v24 = vpop.eup %1873  ;;  %v1076_v25 = vmul.f32 %v1872_v19, %v2280_v2  ;;  %1360 = vst.msk [vmem:[%s2934_s3 + $0x4] sm:$0xf] %vm1358_vm3, %v1623_v0  ;;  %1897 = vpow2.f32 %v1503_v57  ;;  %v2428_v29 = vpop.f32.mrb[20].mxu1  ;;  %v2465_v19 = vadd.f32 %v2242_v38, %v2320_v3  ;;  %v2474_v3 = vadd.f32 %v2242_v38, %v2326_v10 }
 0x107   :  { %v1876_v30 = vpop.eup %1875  ;;  %v1628_v1 = vpack.c.bf16 %v1044_v20, %v1044_v20  ;;  %v1042_v31 = vmul.f32 %v1874_v24, %v2283_v5  ;;  %1392 = vst.msk [vmem:[%s2934_s3 + $0x84] sm:$0xf] %vm1358_vm3, %v1655_v58  ;;  %1899 = vpow2.f32 %v1535_v23  ;;  %v2435_v32 = vpop.f32.mrb[21].mxu0 }
 0x108   :  { %v1878_v34 = vpop.eup %1877  ;;  %v1660_v2 = vpack.c.bf16 %v1076_v25, %v1076_v25  ;;  %v1074_v37 = vmul.f32 %v1876_v30, %v2286_v6  ;;  %v2437_v45 = vpop.f32.mrb[21].mxu1  ;;  %1901 = vpow2.f32 %v1508_v27 }
 0x109   :  { %v1880_v43 = vpop.eup %1879  ;;  %1365 = vst.msk [vmem:[%s2934_s3 + $0x18] sm:$0xf] %vm1358_vm3, %v1628_v1  ;;  %v1626_v5 = vpack.c.bf16 %v1042_v31, %v1042_v31  ;;  %v1045_v42 = vmul.f32 %v1878_v34, %v2291_v11  ;;  %v2443_v54 = vpop.f32.mrb[22].mxu0  ;;  %1903 = vpow2.f32 %v1540_v33  ;;  %v1506_v33 = vmul.f32 -1.442695, %v2465_v19 }
 0x10a   :  { %v1882_v6 = vpop.eup %1881  ;;  %1397 = vst.msk [vmem:[%s2934_s3 + $0x98] sm:$0xf] %vm1358_vm3, %v1660_v2  ;;  %v1658_v36 = vpack.c.bf16 %v1074_v37, %v1074_v37  ;;  %v885_v49 = vadd.f32 1.0, %v1880_v43  ;;  %v2445_v55 = vpop.f32.mrb[22].mxu1 }
 0x10b   :  { %v1884_v60 = vpop.eup %1883  ;;  %1363 = vst.msk [vmem:[%s2934_s3 + $0x10] sm:$0xf] %vm1358_vm3, %v1626_v5  ;;  %v1629_v11 = vpack.c.bf16 %v1045_v42, %v1045_v42  ;;  %v851_v4 = vadd.f32 1.0, %v1882_v6  ;;  %v2451_v7 = vpop.f32.mrb[23].mxu0  ;;  %v2482_v5 = vadd.f32 %v2328_v12, %v2242_v38  ;;  %v2486_v42 = vadd.f32 %v2331_v16, %v2242_v38 }
 0x10c   :  { %v2453_v8 = vpop.f32.mrb[23].mxu1  ;;  %v1886_v14 = vpop.eup %1885  ;;  %1395 = vst.msk [vmem:[%s2934_s3 + $0x90] sm:$0xf] %vm1358_vm3, %v1658_v36  ;;  %1905 = vrcp.f32 %v885_v49  ;;  %v883_v15 = vadd.f32 1.0, %v1884_v60  ;;  %v2494_v60 = vadd.f32 %v2242_v38, %v2333_v17 }
 0x10d   :  { %v1888_v18 = vpop.eup %1887  ;;  %1366 = vst.msk [vmem:[%s2934_s3 + $0x1c] sm:$0xf] %vm1358_vm3, %v1629_v11  ;;  %1907 = vrcp.f32 %v851_v4  ;;  %v856_v57 = vadd.f32 1.0, %v1886_v14  ;;  %v2467_v27 = vpop.f32.mrb[24].mxu0  ;;  %v2498_v11 = vadd.f32 %v2242_v38, %v2339_v22  ;;  %v1538_v22 = vmul.f32 -1.442695, %v2474_v3 }
 0x10e   :  { %v1890_v0 = vpop.eup %1889  ;;  %1909 = vrcp.f32 %v883_v15  ;;  %v888_v20 = vadd.f32 1.0, %v1888_v18  ;;  %v2469_v30 = vpop.f32.mrb[24].mxu1  ;;  %v2506_v15 = vadd.f32 %v2357_v44, %v2242_v38  ;;  %v2510_v18 = vadd.f32 %v2359_v48, %v2242_v38 }
 0x10f   :  { %v1892_v23 = vpop.eup %1891  ;;  %1911 = vrcp.f32 %v856_v57  ;;  %v854_v24 = vadd.f32 1.0, %v1890_v0  ;;  %v2476_v34 = vpop.f32.mrb[25].mxu0  ;;  %v2515_v0 = vadd.f32 %v2242_v38, %v2367_v46  ;;  %v1541_v44 = vmul.f32 -1.442695, %v2486_v42 }
 0x110   :  { %v1894_v58 = vpop.eup %1893  ;;  %1913 = vrcp.f32 %v888_v20  ;;  %v886_v25 = vadd.f32 1.0, %v1892_v23  ;;  %v2478_v2 = vpop.f32.mrb[25].mxu1  ;;  %v1512_v46 = vmul.f32 -1.442695, %v2506_v15 }
 0x111   :  { %v1896_v1 = vpop.eup %1895  ;;  %1915 = vrcp.f32 %v854_v24  ;;  %v857_v31 = vadd.f32 1.0, %v1894_v58  ;;  %v2488_v6 = vpop.f32.mrb[26].mxu0  ;;  %v1509_v24 = vmul.f32 -1.442695, %v2482_v5 }
 0x112   :  { %v1898_v37 = vpop.eup %1897  ;;  %1917 = vrcp.f32 %v886_v25  ;;  %v889_v43 = vadd.f32 1.0, %v1896_v1  ;;  %v2490_v36 = vpop.f32.mrb[26].mxu1  ;;  %v1507_v25 = vmul.f32 -1.442695, %v2494_v60  ;;  %v1539_v1 = vmul.f32 -1.442695, %v2498_v11 }
 0x113   :  { %v1900_v10 = vpop.eup %1899  ;;  %1919 = vrcp.f32 %v857_v31  ;;  %v855_v49 = vadd.f32 1.0, %v1898_v37  ;;  %v2500_v12 = vpop.f32.mrb[27].mxu0 }
 0x114   :  { %v2502_v4 = vpop.f32.mrb[27].mxu1  ;;  %v1902_v16 = vpop.eup %1901  ;;  %1921 = vrcp.f32 %v889_v43  ;;  %v887_v14 = vadd.f32 1.0, %v1900_v10  ;;  %v1544_v43 = vmul.f32 -1.442695, %v2510_v18 }
 0x115   :  { %v1904_v17 = vpop.eup %1903  ;;  %1923 = vrcp.f32 %v855_v49  ;;  %v860_v57 = vadd.f32 1.0, %v1902_v16  ;;  %v2525_v10 = vpop.f32.mrb[28].mxu0 }
 0x116   :  { %v1906_v20 = vpop.eup %1905  ;;  %1925 = vrcp.f32 %v887_v14  ;;  %v892_v23 = vadd.f32 1.0, %v1904_v17  ;;  %2935 = vst [vmem:[#allocation2_spill] sm:$0xff] %v2525_v10  ;;  %v2527_v49 = vpop.f32.mrb[28].mxu1  ;;  %v1510_v17 = vmul.f32 -1.442695, %v2515_v0  ;;  %v2538_v10 = vadd.f32 %v2242_v38, %v2369_v53 }
 0x117   :  { %v1908_v58 = vpop.eup %1907  ;;  %v1077_v48 = vmul.f32 %v1906_v20, %v2297_v35  ;;  %1927 = vrcp.f32 %v860_v57  ;;  %2936 = vst [vmem:[#allocation3_spill] sm:$0xff] %v2527_v49  ;;  %v2531_v57 = vpop.f32.mrb[29].mxu0 }
 0x118   :  { %v1910_v31 = vpop.eup %1909  ;;  %v1043_v37 = vmul.f32 %v1908_v58, %v2300_v40  ;;  %1929 = vrcp.f32 %v892_v23  ;;  %v2533_v20 = vpop.f32.mrb[29].mxu1 }
 0x119   :  { %v1912_v16 = vpop.eup %1911  ;;  %v1661_v14 = vpack.c.bf16 %v1077_v48, %v1077_v48  ;;  %v1075_v35 = vmul.f32 %v1910_v31, %v2303_v47  ;;  %1931 = vpow2.f32 %v1506_v33  ;;  %v2540_v49 = vpop.f32.mrb[30].mxu0 }
 0x11a   :  { %v1914_v40 = vpop.eup %1913  ;;  %v1627_v23 = vpack.c.bf16 %v1043_v37, %v1043_v37  ;;  %v1048_v58 = vmul.f32 %v1912_v16, %v2306_v50  ;;  %1933 = vpow2.f32 %v1538_v22  ;;  %v2542_v48 = vpop.f32.mrb[30].mxu1  ;;  %v2551_v50 = vadd.f32 %v2380_v61, %v2242_v38 }
 0x11b   :  { %v1916_v47 = vpop.eup %1915  ;;  %1398 = vst.msk [vmem:[%s2934_s3 + $0x9c] sm:$0xf] %vm1358_vm3, %v1661_v14  ;;  %v1659_v33 = vpack.c.bf16 %v1075_v35, %v1075_v35  ;;  %v1080_v31 = vmul.f32 %v1914_v40, %v2310_v56  ;;  %1935 = vpow2.f32 %v1509_v24  ;;  %v2553_v53 = vpop.f32.mrb[31].mxu0  ;;  %v2564_v56 = vadd.f32 %v2382_v62, %v2242_v38 }
 0x11c   :  { %v2555_v22 = vpop.f32.mrb[31].mxu1  ;;  %v1918_v37 = vpop.eup %1917  ;;  %1364 = vst.msk [vmem:[%s2934_s3 + $0x14] sm:$0xf] %vm1358_vm3, %v1627_v23  ;;  %v1632_v16 = vpack.c.bf16 %v1048_v58, %v1048_v58  ;;  %v1046_v14 = vmul.f32 %v1916_v47, %v2316_v63  ;;  %1937 = vpow2.f32 %v1541_v44  ;;  %v2573_v40 = vadd.f32 %v2242_v38, %v2393_v59 }
 0x11d   :  { %v1920_v61 = vpop.eup %1919  ;;  %1396 = vst.msk [vmem:[%s2934_s3 + $0x94] sm:$0xf] %vm1358_vm3, %v1659_v33  ;;  %v1664_v24 = vpack.c.bf16 %v1080_v31, %v1080_v31  ;;  %v1078_v35 = vmul.f32 %v1918_v37, %v2324_v9  ;;  %1939 = vpow2.f32 %v1507_v25  ;;  %v1542_v23 = vmul.f32 -1.442695, %v2538_v10 }
 0x11e   :  { %v1922_v63 = vpop.eup %1921  ;;  %1369 = vst.msk [vmem:[%s2934_s3 + $0x28] sm:$0xf] %vm1358_vm3, %v1632_v16  ;;  %v1630_v62 = vpack.c.bf16 %v1046_v14, %v1046_v14  ;;  %v1049_v44 = vmul.f32 %v1920_v61, %v2337_v21  ;;  %1941 = vpow2.f32 %v1539_v1  ;;  %v1513_v25 = vmul.f32 -1.442695, %v2551_v50 }
 0x11f   :  { %v1924_v58 = vpop.eup %1923  ;;  %1401 = vst.msk [vmem:[%s2934_s3 + $0xa8] sm:$0xf] %vm1358_vm3, %v1664_v24  ;;  %v1662_v9 = vpack.c.bf16 %v1078_v35, %v1078_v35  ;;  %v1081_v59 = vmul.f32 %v1922_v63, %v2344_v26  ;;  %1943 = vpow2.f32 %v1512_v46  ;;  %v1545_v33 = vmul.f32 -1.442695, %v2564_v56 }
 0x120   :  { %v1926_v47 = vpop.eup %1925  ;;  %1367 = vst.msk [vmem:[%s2934_s3 + $0x20] sm:$0xf] %vm1358_vm3, %v1630_v62  ;;  %v1633_v21 = vpack.c.bf16 %v1049_v44, %v1049_v44  ;;  %v1047_v1 = vmul.f32 %v1924_v58, %v2349_v28  ;;  %1945 = vpow2.f32 %v1544_v43  ;;  %v1511_v37 = vmul.f32 -1.442695, %v2573_v40 }
 0x121   :  { %v1928_v31 = vpop.eup %1927  ;;  %1399 = vst.msk [vmem:[%s2934_s3 + $0xa0] sm:$0xf] %vm1358_vm3, %v1662_v9  ;;  %v1665_v26 = vpack.c.bf16 %v1081_v59, %v1081_v59  ;;  %v1079_v46 = vmul.f32 %v1926_v47, %v2353_v41  ;;  %1947 = vpow2.f32 %v1510_v17 }
 0x122   :  { %v1930_v16 = vpop.eup %1929  ;;  %1370 = vst.msk [vmem:[%s2934_s3 + $0x2c] sm:$0xf] %vm1358_vm3, %v1633_v21  ;;  %v1631_v28 = vpack.c.bf16 %v1047_v1, %v1047_v1  ;;  %v1052_v43 = vmul.f32 %v1928_v31, %v2378_v51  ;;  %1949 = vpow2.f32 %v1542_v23 }
 0x123   :  { %v1932_v14 = vpop.eup %1931  ;;  %1402 = vst.msk [vmem:[%s2934_s3 + $0xac] sm:$0xf] %vm1358_vm3, %v1665_v26  ;;  %v1663_v41 = vpack.c.bf16 %v1079_v46, %v1079_v46  ;;  %v1084_v17 = vmul.f32 %v1930_v16, %v2391_v52  ;;  %1951 = vpow2.f32 %v1513_v25  ;;  %v2627_v25 = vadd.f32 %v2242_v38, %v2395_v13 }
 0x124   :  { %v1934_v61 = vpop.eup %1933  ;;  %1368 = vst.msk [vmem:[%s2934_s3 + $0x24] sm:$0xf] %vm1358_vm3, %v1631_v28  ;;  %v1636_v24 = vpack.c.bf16 %v1052_v43, %v1052_v43  ;;  %v858_v35 = vadd.f32 1.0, %v1932_v14  ;;  %1953 = vpow2.f32 %v1545_v33  ;;  %v2631_v46 = vadd.f32 %v2426_v39, %v2242_v38 }
 0x125   :  { %v1936_v51 = vpop.eup %1935  ;;  %1400 = vst.msk [vmem:[%s2934_s3 + $0xa4] sm:$0xf] %vm1358_vm3, %v1663_v41  ;;  %v1668_v63 = vpack.c.bf16 %v1084_v17, %v1084_v17  ;;  %v890_v62 = vadd.f32 1.0, %v1934_v61  ;;  %1955 = vpow2.f32 %v1511_v37  ;;  %v2635_v37 = vadd.f32 %v2428_v29, %v2242_v38 }
 0x126   :  { %v1938_v52 = vpop.eup %1937  ;;  %1373 = vst.msk [vmem:[%s2934_s3 + $0x38] sm:$0xf] %vm1358_vm3, %v1636_v24  ;;  %1957 = vrcp.f32 %v858_v35  ;;  %v861_v44 = vadd.f32 1.0, %v1936_v51  ;;  %v1543_v28 = vmul.f32 -1.442695, %v2627_v25  ;;  %v2640_v43 = vadd.f32 %v2242_v38, %v2435_v32 }
 0x127   :  { %v1940_v23 = vpop.eup %1939  ;;  %1405 = vst.msk [vmem:[%s2934_s3 + $0xb8] sm:$0xf] %vm1358_vm3, %v1668_v63  ;;  %1959 = vrcp.f32 %v890_v62  ;;  %v893_v58 = vadd.f32 1.0, %v1938_v52  ;;  %v2644_v39 = vadd.f32 %v2242_v38, %v2437_v45  ;;  %v2648_v29 = vadd.f32 %v2443_v54, %v2242_v38 }
 0x128   :  { %v1942_v9 = vpop.eup %1941  ;;  %1961 = vrcp.f32 %v861_v44  ;;  %v859_v59 = vadd.f32 1.0, %v1940_v23  ;;  %v2652_v24 = vadd.f32 %v2445_v55, %v2242_v38  ;;  %v2656_v32 = vadd.f32 %v2242_v38, %v2451_v7 }
 0x129   :  { %v1944_v47 = vpop.eup %1943  ;;  %1963 = vrcp.f32 %v893_v58  ;;  %v891_v21 = vadd.f32 1.0, %v1942_v9  ;;  %v1516_v45 = vmul.f32 -1.442695, %v2631_v46  ;;  %v1548_v63 = vmul.f32 -1.442695, %v2635_v37 }
 0x12a   :  { %v1946_v1 = vpop.eup %1945  ;;  %1965 = vrcp.f32 %v859_v59  ;;  %v864_v33 = vadd.f32 1.0, %v1944_v47  ;;  %v1514_v52 = vmul.f32 -1.442695, %v2640_v43  ;;  %v2663_v55 = vadd.f32 %v2242_v38, %v2453_v8 }
 0x12b   :  { %v1948_v31 = vpop.eup %1947  ;;  %1967 = vrcp.f32 %v891_v21  ;;  %v896_v26 = vadd.f32 1.0, %v1946_v1  ;;  %v1546_v23 = vmul.f32 -1.442695, %v2644_v39  ;;  %v1517_v58 = vmul.f32 -1.442695, %v2648_v29 }
 0x12c   :  { %v1950_v16 = vpop.eup %1949  ;;  %1969 = vrcp.f32 %v864_v33  ;;  %v862_v13 = vadd.f32 1.0, %v1948_v31  ;;  %v1549_v47 = vmul.f32 -1.442695, %v2652_v24  ;;  %v1515_v21 = vmul.f32 -1.442695, %v2656_v32 }
 0x12d   :  { %v1952_v14 = vpop.eup %1951  ;;  %1971 = vrcp.f32 %v896_v26  ;;  %v894_v41 = vadd.f32 1.0, %v1950_v16 }
 0x12e   :  { %v1954_v17 = vpop.eup %1953  ;;  %1973 = vrcp.f32 %v862_v13  ;;  %v865_v61 = vadd.f32 1.0, %v1952_v14 }
 0x12f   :  { %v1956_v35 = vpop.eup %1955  ;;  %1975 = vrcp.f32 %v894_v41  ;;  %v897_v51 = vadd.f32 1.0, %v1954_v17  ;;  %v2694_v17 = vadd.f32 %v2242_v38, %v2476_v34 }
 0x130   :  { %v1958_v54 = vpop.eup %1957  ;;  %1977 = vrcp.f32 %v865_v61  ;;  %v863_v62 = vadd.f32 1.0, %v1956_v35  ;;  %v2703_v35 = vadd.f32 %v2242_v38, %v2478_v2 }
 0x131   :  { %v1960_v44 = vpop.eup %1959  ;;  %v1050_v7 = vmul.f32 %v1958_v54, %v2465_v19  ;;  %1979 = vrcp.f32 %v897_v51  ;;  %v2674_v19 = vadd.f32 %v2467_v27, %v2242_v38  ;;  %v2685_v27 = vadd.f32 %v2469_v30, %v2242_v38 }
 0x132   :  { %v1962_v9 = vpop.eup %1961  ;;  %v1082_v59 = vmul.f32 %v1960_v44, %v2474_v3  ;;  %1981 = vrcp.f32 %v863_v62  ;;  %v1547_v3 = vmul.f32 -1.442695, %v2663_v55 }
 0x133   :  { %v1964_v1 = vpop.eup %1963  ;;  %v1634_v33 = vpack.c.bf16 %v1050_v7, %v1050_v7  ;;  %v1053_v8 = vmul.f32 %v1962_v9, %v2482_v5  ;;  %1983 = vpow2.f32 %v1543_v28 }
 0x134   :  { %v1966_v31 = vpop.eup %1965  ;;  %v1666_v26 = vpack.c.bf16 %v1082_v59, %v1082_v59  ;;  %v1085_v16 = vmul.f32 %v1964_v1, %v2486_v42  ;;  %1985 = vpow2.f32 %v1516_v45  ;;  %v1520_v45 = vmul.f32 -1.442695, %v2674_v19 }
 0x135   :  { %v1968_v13 = vpop.eup %1967  ;;  %1371 = vst.msk [vmem:[%s2934_s3 + $0x30] sm:$0xf] %vm1358_vm3, %v1634_v33  ;;  %v1637_v14 = vpack.c.bf16 %v1053_v8, %v1053_v8  ;;  %v1051_v5 = vmul.f32 %v1966_v31, %v2494_v60  ;;  %1987 = vpow2.f32 %v1548_v63 }
 0x136   :  { %v1970_v28 = vpop.eup %1969  ;;  %1403 = vst.msk [vmem:[%s2934_s3 + $0xb0] sm:$0xf] %vm1358_vm3, %v1666_v26  ;;  %v1669_v42 = vpack.c.bf16 %v1085_v16, %v1085_v16  ;;  %v1083_v41 = vmul.f32 %v1968_v13, %v2498_v11  ;;  %1989 = vpow2.f32 %v1514_v52  ;;  %v1518_v52 = vmul.f32 -1.442695, %v2694_v17 }
 0x137   :  { %v1972_v60 = vpop.eup %1971  ;;  %1374 = vst.msk [vmem:[%s2934_s3 + $0x3c] sm:$0xf] %vm1358_vm3, %v1637_v14  ;;  %v1635_v30 = vpack.c.bf16 %v1051_v5, %v1051_v5  ;;  %v1056_v61 = vmul.f32 %v1970_v28, %v2506_v15  ;;  %1991 = vpow2.f32 %v1546_v23  ;;  %v1552_v15 = vmul.f32 -1.442695, %v2685_v27 }
 0x138   :  { %v1974_v11 = vpop.eup %1973  ;;  %1406 = vst.msk [vmem:[%s2934_s3 + $0xbc] sm:$0xf] %vm1358_vm3, %v1669_v42  ;;  %v1667_v34 = vpack.c.bf16 %v1083_v41, %v1083_v41  ;;  %v1088_v51 = vmul.f32 %v1972_v60, %v2510_v18  ;;  %1993 = vpow2.f32 %v1517_v58  ;;  %v1550_v23 = vmul.f32 -1.442695, %v2703_v35 }
 0x139   :  { %v1976_v63 = vpop.eup %1975  ;;  %1372 = vst.msk [vmem:[%s2934_s3 + $0x34] sm:$0xf] %vm1358_vm3, %v1635_v30  ;;  %v1640_v38 = vpack.c.bf16 %v1056_v61, %v1056_v61  ;;  %v1054_v2 = vmul.f32 %v1974_v11, %v2515_v0  ;;  %1995 = vpow2.f32 %v1549_v47  ;;  %v2083_v61 = vld [vmem:[%s2933_s2] ss:$0 sm:$0xff] }
 0x13a   :  { %v1978_v54 = vpop.eup %1977  ;;  %1404 = vst.msk [vmem:[%s2934_s3 + $0xb4] sm:$0xf] %vm1358_vm3, %v1667_v34  ;;  %v1672_v18 = vpack.c.bf16 %v1088_v51, %v1088_v51  ;;  %v1086_v62 = vmul.f32 %v1976_v63, %v2538_v10  ;;  %1997 = vpow2.f32 %v1515_v21  ;;  %v2759_v11 = vadd.f32 %v2083_v61, %v2488_v6  ;;  %v2938_v6 = vld [vmem:[#allocation3_spill] sm:$0xff] }
 0x13b   :  { %v1980_v44 = vpop.eup %1979  ;;  %1377 = vst.msk [vmem:[%s2934_s3 + $0x48] sm:$0xf] %vm1358_vm3, %v1640_v38  ;;  %v1638_v0 = vpack.c.bf16 %v1054_v2, %v1054_v2  ;;  %v1057_v7 = vmul.f32 %v1978_v54, %v2551_v50  ;;  %1999 = vpow2.f32 %v1547_v3  ;;  %v2762_v34 = vadd.f32 %v2083_v61, %v2490_v36  ;;  %v2937_v54 = vld [vmem:[#allocation2_spill] sm:$0xff] }
 0x13c   :  { %v1982_v58 = vpop.eup %1981  ;;  %1409 = vst.msk [vmem:[%s2934_s3 + $0xc8] sm:$0xf] %vm1358_vm3, %v1672_v18  ;;  %v1670_v10 = vpack.c.bf16 %v1086_v62, %v1086_v62  ;;  %v1089_v9 = vmul.f32 %v1980_v44, %v2564_v56  ;;  %2001 = vpow2.f32 %v1520_v45  ;;  %v2765_v63 = vadd.f32 %v2083_v61, %v2500_v12 }
 0x13d   :  { %v1984_v59 = vpop.eup %1983  ;;  %1375 = vst.msk [vmem:[%s2934_s3 + $0x40] sm:$0xf] %vm1358_vm3, %v1638_v0  ;;  %v1641_v50 = vpack.c.bf16 %v1057_v7, %v1057_v7  ;;  %v1055_v47 = vmul.f32 %v1982_v58, %v2573_v40  ;;  %2003 = vpow2.f32 %v1552_v15  ;;  %v2768_v38 = vadd.f32 %v2083_v61, %v2502_v4 }
 0x13e   :  { %v1986_v21 = vpop.eup %1985  ;;  %1407 = vst.msk [vmem:[%s2934_s3 + $0xc0] sm:$0xf] %vm1358_vm3, %v1670_v10  ;;  %v1673_v1 = vpack.c.bf16 %v1089_v9, %v1089_v9  ;;  %v895_v33 = vadd.f32 1.0, %v1984_v59  ;;  %2005 = vpow2.f32 %v1518_v52  ;;  %v2771_v18 = vadd.f32 %v2083_v61, %v2937_v54 }
 0x13f   :  { %v1988_v56 = vpop.eup %1987  ;;  %1378 = vst.msk [vmem:[%s2934_s3 + $0x4c] sm:$0xf] %vm1358_vm3, %v1641_v50  ;;  %v1639_v8 = vpack.c.bf16 %v1055_v47, %v1055_v47  ;;  %v868_v31 = vadd.f32 1.0, %v1986_v21  ;;  %2007 = vpow2.f32 %v1550_v23  ;;  %v2774_v62 = vadd.f32 %v2083_v61, %v2938_v6 }
 0x140   :  { %v1990_v40 = vpop.eup %1989  ;;  %1410 = vst.msk [vmem:[%s2934_s3 + $0xcc] sm:$0xf] %vm1358_vm3, %v1673_v1  ;;  %2009 = vrcp.f32 %v895_v33  ;;  %v900_v26 = vadd.f32 1.0, %v1988_v56  ;;  %v2777_v44 = vadd.f32 %v2083_v61, %v2531_v57  ;;  %v2780_v12 = vadd.f32 %v2083_v61, %v2533_v20 }
 0x141   :  { %v1992_v16 = vpop.eup %1991  ;;  %1376 = vst.msk [vmem:[%s2934_s3 + $0x44] sm:$0xf] %vm1358_vm3, %v1639_v8  ;;  %2011 = vrcp.f32 %v868_v31  ;;  %v866_v3 = vadd.f32 1.0, %v1990_v40  ;;  %v1521_v7 = vmul.f32 -1.442695, %v2759_v11 }
 0x142   :  { %v1994_v13 = vpop.eup %1993  ;;  %2013 = vrcp.f32 %v900_v26  ;;  %v898_v14 = vadd.f32 1.0, %v1992_v16  ;;  %v1553_v23 = vmul.f32 -1.442695, %v2762_v34  ;;  %v1519_v9 = vmul.f32 -1.442695, %v2765_v63 }
 0x143   :  { %v1996_v5 = vpop.eup %1995  ;;  %2015 = vrcp.f32 %v866_v3  ;;  %v869_v28 = vadd.f32 1.0, %v1994_v13  ;;  %v1551_v59 = vmul.f32 -1.442695, %v2768_v38  ;;  %v1524_v20 = vmul.f32 -1.442695, %v2771_v18 }
 0x144   :  { %v1998_v42 = vpop.eup %1997  ;;  %2017 = vrcp.f32 %v898_v14  ;;  %v901_v41 = vadd.f32 1.0, %v1996_v5  ;;  %v1556_v47 = vmul.f32 -1.442695, %v2774_v62  ;;  %v1522_v33 = vmul.f32 -1.442695, %v2777_v44 }
 0x145   :  { %v2000_v60 = vpop.eup %1999  ;;  %2019 = vrcp.f32 %v869_v28  ;;  %v867_v30 = vadd.f32 1.0, %v1998_v42  ;;  %v1554_v56 = vmul.f32 -1.442695, %v2780_v12  ;;  %v2814_v28 = vadd.f32 %v2083_v61, %v2555_v22 }
 0x146   :  { %v2002_v51 = vpop.eup %2001  ;;  %2021 = vrcp.f32 %v901_v41  ;;  %v899_v45 = vadd.f32 1.0, %v2000_v60 }
 0x147   :  { %v2004_v2 = vpop.eup %2003  ;;  %2023 = vrcp.f32 %v867_v30  ;;  %v872_v15 = vadd.f32 1.0, %v2002_v51  ;;  %v1555_v54 = vmul.f32 -1.442695, %v2814_v28 }
 0x148   :  { %v2006_v36 = vpop.eup %2005  ;;  %2025 = vrcp.f32 %v899_v45  ;;  %v904_v52 = vadd.f32 1.0, %v2004_v2 }
 0x149   :  { %v2008_v4 = vpop.eup %2007  ;;  %2027 = vrcp.f32 %v872_v15  ;;  %v870_v0 = vadd.f32 1.0, %v2006_v36 }
 0x14a   :  { %v2010_v58 = vpop.eup %2009  ;;  %2029 = vrcp.f32 %v904_v52  ;;  %v902_v10 = vadd.f32 1.0, %v2008_v4 }
 0x14b   :  { %v2012_v50 = vpop.eup %2011  ;;  %v1087_v57 = vmul.f32 %v2010_v58, %v2627_v25  ;;  %2031 = vrcp.f32 %v870_v0  ;;  %v2794_v25 = vadd.f32 %v2083_v61, %v2540_v49  ;;  %v2806_v49 = vadd.f32 %v2083_v61, %v2553_v53 }
 0x14c   :  { %v2014_v21 = vpop.eup %2013  ;;  %v1060_v1 = vmul.f32 %v2012_v50, %v2631_v46  ;;  %2033 = vrcp.f32 %v902_v10  ;;  %v2798_v46 = vadd.f32 %v2083_v61, %v2542_v48 }
 0x14d   :  { %v2016_v8 = vpop.eup %2015  ;;  %v1671_v31 = vpack.c.bf16 %v1087_v57, %v1087_v57  ;;  %v1092_v40 = vmul.f32 %v2014_v21, %v2635_v37  ;;  %2035 = vpow2.f32 %v1521_v7  ;;  %v1525_v41 = vmul.f32 -1.442695, %v2794_v25 }
 0x14e   :  { %v2018_v26 = vpop.eup %2017  ;;  %v1644_v16 = vpack.c.bf16 %v1060_v1, %v1060_v1  ;;  %v1058_v3 = vmul.f32 %v2016_v8, %v2640_v43  ;;  %2037 = vpow2.f32 %v1553_v23  ;;  %v1557_v30 = vmul.f32 -1.442695, %v2798_v46 }
 0x14f   :  { %v2020_v13 = vpop.eup %2019  ;;  %1408 = vst.msk [vmem:[%s2934_s3 + $0xc4] sm:$0xf] %vm1358_vm3, %v1671_v31  ;;  %v1676_v14 = vpack.c.bf16 %v1092_v40, %v1092_v40  ;;  %v1090_v37 = vmul.f32 %v2018_v26, %v2644_v39  ;;  %2039 = vpow2.f32 %v1519_v9  ;;  %v1523_v45 = vmul.f32 -1.442695, %v2806_v49 }
 0x150   :  { %v2022_v5 = vpop.eup %2021  ;;  %1381 = vst.msk [vmem:[%s2934_s3 + $0x58] sm:$0xf] %vm1358_vm3, %v1644_v16  ;;  %v1642_v48 = vpack.c.bf16 %v1058_v3, %v1058_v3  ;;  %v1061_v43 = vmul.f32 %v2020_v13, %v2648_v29  ;;  %2041 = vpow2.f32 %v1551_v59 }
 0x151   :  { %v2024_v42 = vpop.eup %2023  ;;  %1413 = vst.msk [vmem:[%s2934_s3 + $0xd8] sm:$0xf] %vm1358_vm3, %v1676_v14  ;;  %v1674_v53 = vpack.c.bf16 %v1090_v37, %v1090_v37  ;;  %v1093_v39 = vmul.f32 %v2022_v5, %v2652_v24  ;;  %2043 = vpow2.f32 %v1524_v20 }
 0x152   :  { %v2026_v60 = vpop.eup %2025  ;;  %1379 = vst.msk [vmem:[%s2934_s3 + $0x50] sm:$0xf] %vm1358_vm3, %v1642_v48  ;;  %v1645_v22 = vpack.c.bf16 %v1061_v43, %v1061_v43  ;;  %v1059_v29 = vmul.f32 %v2024_v42, %v2656_v32  ;;  %2045 = vpow2.f32 %v1556_v47 }
 0x153   :  { %v2028_v61 = vpop.eup %2027  ;;  %1411 = vst.msk [vmem:[%s2934_s3 + $0xd0] sm:$0xf] %vm1358_vm3, %v1674_v53  ;;  %v1677_v24 = vpack.c.bf16 %v1093_v39, %v1093_v39  ;;  %v1091_v51 = vmul.f32 %v2026_v60, %v2663_v55  ;;  %2047 = vpow2.f32 %v1522_v33 }
 0x154   :  { %v2030_v2 = vpop.eup %2029  ;;  %1382 = vst.msk [vmem:[%s2934_s3 + $0x5c] sm:$0xf] %vm1358_vm3, %v1645_v22  ;;  %v1643_v32 = vpack.c.bf16 %v1059_v29, %v1059_v29  ;;  %v1064_v15 = vmul.f32 %v2028_v61, %v2674_v19  ;;  %2049 = vpow2.f32 %v1554_v56 }
 0x155   :  { %v2032_v6 = vpop.eup %2031  ;;  %1414 = vst.msk [vmem:[%s2934_s3 + $0xdc] sm:$0xf] %vm1358_vm3, %v1677_v24  ;;  %v1675_v55 = vpack.c.bf16 %v1091_v51, %v1091_v51  ;;  %v1096_v36 = vmul.f32 %v2030_v2, %v2685_v27  ;;  %2051 = vpow2.f32 %v1525_v41 }
 0x156   :  { %v2034_v52 = vpop.eup %2033  ;;  %1380 = vst.msk [vmem:[%s2934_s3 + $0x54] sm:$0xf] %vm1358_vm3, %v1643_v32  ;;  %v1648_v19 = vpack.c.bf16 %v1064_v15, %v1064_v15  ;;  %v1062_v4 = vmul.f32 %v2032_v6, %v2694_v17  ;;  %2053 = vpow2.f32 %v1557_v30 }
 0x157   :  { %v2036_v0 = vpop.eup %2035  ;;  %1412 = vst.msk [vmem:[%s2934_s3 + $0xd4] sm:$0xf] %vm1358_vm3, %v1675_v55  ;;  %v1680_v7 = vpack.c.bf16 %v1096_v36, %v1096_v36  ;;  %v1094_v27 = vmul.f32 %v2034_v52, %v2703_v35  ;;  %2055 = vpow2.f32 %v1523_v45 }
 0x158   :  { %v2038_v23 = vpop.eup %2037  ;;  %1385 = vst.msk [vmem:[%s2934_s3 + $0x68] sm:$0xf] %vm1358_vm3, %v1648_v19  ;;  %v1646_v58 = vpack.c.bf16 %v1062_v4, %v1062_v4  ;;  %v873_v10 = vadd.f32 1.0, %v2036_v0  ;;  %2057 = vpow2.f32 %v1555_v54 }
 0x159   :  { %v2040_v17 = vpop.eup %2039  ;;  %1417 = vst.msk [vmem:[%s2934_s3 + $0xe8] sm:$0xf] %vm1358_vm3, %v1680_v7  ;;  %v1678_v9 = vpack.c.bf16 %v1094_v27, %v1094_v27  ;;  %v905_v59 = vadd.f32 1.0, %v2038_v23 }
 0x15a   :  { %v2042_v50 = vpop.eup %2041  ;;  %1383 = vst.msk [vmem:[%s2934_s3 + $0x60] sm:$0xf] %vm1358_vm3, %v1646_v58  ;;  %2059 = vrcp.f32 %v873_v10  ;;  %v871_v35 = vadd.f32 1.0, %v2040_v17 }
 0x15b   :  { %v2044_v57 = vpop.eup %2043  ;;  %1415 = vst.msk [vmem:[%s2934_s3 + $0xe0] sm:$0xf] %vm1358_vm3, %v1678_v9  ;;  %2061 = vrcp.f32 %v905_v59  ;;  %v903_v20 = vadd.f32 1.0, %v2042_v50 }
 0x15c   :  { %v2046_v47 = vpop.eup %2045  ;;  %2063 = vrcp.f32 %v871_v35  ;;  %v876_v21 = vadd.f32 1.0, %v2044_v57 }
 0x15d   :  { %v2048_v1 = vpop.eup %2047  ;;  %2065 = vrcp.f32 %v903_v20  ;;  %v908_v33 = vadd.f32 1.0, %v2046_v47 }
 0x15e   :  { %v2050_v56 = vpop.eup %2049  ;;  %2067 = vrcp.f32 %v876_v21  ;;  %v874_v8 = vadd.f32 1.0, %v2048_v1 }
 0x15f   :  { %v2052_v31 = vpop.eup %2051  ;;  %2069 = vrcp.f32 %v908_v33  ;;  %v906_v40 = vadd.f32 1.0, %v2050_v56 }
 0x160   :  { %v2054_v26 = vpop.eup %2053  ;;  %2071 = vrcp.f32 %v874_v8  ;;  %v877_v16 = vadd.f32 1.0, %v2052_v31 }
 0x161   :  { %v2056_v3 = vpop.eup %2055  ;;  %2073 = vrcp.f32 %v906_v40  ;;  %v909_v13 = vadd.f32 1.0, %v2054_v26 }
 0x162   :  { %v2058_v14 = vpop.eup %2057  ;;  %2075 = vrcp.f32 %v877_v16  ;;  %v875_v37 = vadd.f32 1.0, %v2056_v3 }
 0x163   :  { %2077 = vrcp.f32 %v909_v13  ;;  %v907_v5 = vadd.f32 1.0, %v2058_v14 }
 0x164   :  { %v2060_v48 = vpop.eup %2059  ;;  %2079 = vrcp.f32 %v875_v37 }
 0x165   :  { %v2062_v43 = vpop.eup %2061  ;;  %v1065_v42 = vmul.f32 %v2060_v48, %v2759_v11  ;;  %2081 = vrcp.f32 %v907_v5 }
 0x166   :  { %v2064_v53 = vpop.eup %2063  ;;  %v1097_v39 = vmul.f32 %v2062_v43, %v2762_v34 }
 0x167   :  { %v2066_v41 = vpop.eup %2065  ;;  %v1649_v60 = vpack.c.bf16 %v1065_v42, %v1065_v42  ;;  %v1063_v22 = vmul.f32 %v2064_v53, %v2765_v63 }
 0x168   :  { %v2068_v29 = vpop.eup %2067  ;;  %v1681_v30 = vpack.c.bf16 %v1097_v39, %v1097_v39  ;;  %v1095_v61 = vmul.f32 %v2066_v41, %v2768_v38 }
 0x169   :  { %v2070_v24 = vpop.eup %2069  ;;  %1386 = vst.msk [vmem:[%s2934_s3 + $0x6c] sm:$0xf] %vm1358_vm3, %v1649_v60  ;;  %v1647_v51 = vpack.c.bf16 %v1063_v22, %v1063_v22  ;;  %v1068_v11 = vmul.f32 %v2068_v29, %v2771_v18 }
 0x16a   :  { %v2072_v45 = vpop.eup %2071  ;;  %1418 = vst.msk [vmem:[%s2934_s3 + $0xec] sm:$0xf] %vm1358_vm3, %v1681_v30  ;;  %v1679_v34 = vpack.c.bf16 %v1095_v61, %v1095_v61  ;;  %v1100_v63 = vmul.f32 %v2070_v24, %v2774_v62 }
 0x16b   :  { %v2074_v2 = vpop.eup %2073  ;;  %1384 = vst.msk [vmem:[%s2934_s3 + $0x64] sm:$0xf] %vm1358_vm3, %v1647_v51  ;;  %v1652_v38 = vpack.c.bf16 %v1068_v11, %v1068_v11  ;;  %v1066_v32 = vmul.f32 %v2072_v45, %v2777_v44 }
 0x16c   :  { %v2076_v15 = vpop.eup %2075  ;;  %1416 = vst.msk [vmem:[%s2934_s3 + $0xe4] sm:$0xf] %vm1358_vm3, %v1679_v34  ;;  %v1684_v18 = vpack.c.bf16 %v1100_v63, %v1100_v63  ;;  %v1098_v54 = vmul.f32 %v2074_v2, %v2780_v12 }
 0x16d   :  { %v2078_v6 = vpop.eup %2077  ;;  %1389 = vst.msk [vmem:[%s2934_s3 + $0x78] sm:$0xf] %vm1358_vm3, %v1652_v38  ;;  %v1650_v62 = vpack.c.bf16 %v1066_v32, %v1066_v32  ;;  %v1069_v55 = vmul.f32 %v2076_v15, %v2794_v25 }
 0x16e   :  { %v2080_v36 = vpop.eup %2079  ;;  %1421 = vst.msk [vmem:[%s2934_s3 + $0xf8] sm:$0xf] %vm1358_vm3, %v1684_v18  ;;  %v1682_v44 = vpack.c.bf16 %v1098_v54, %v1098_v54  ;;  %v1101_v52 = vmul.f32 %v2078_v6, %v2798_v46 }
 0x16f   :  { %v2082_v19 = vpop.eup %2081  ;;  %1387 = vst.msk [vmem:[%s2934_s3 + $0x70] sm:$0xf] %vm1358_vm3, %v1650_v62  ;;  %v1653_v12 = vpack.c.bf16 %v1069_v55, %v1069_v55  ;;  %v1067_v4 = vmul.f32 %v2080_v36, %v2806_v49 }
 0x170   :  { %1419 = vst.msk [vmem:[%s2934_s3 + $0xf0] sm:$0xf] %vm1358_vm3, %v1682_v44  ;;  %v1685_v25 = vpack.c.bf16 %v1101_v52, %v1101_v52  ;;  %v1099_v0 = vmul.f32 %v2082_v19, %v2814_v28 }
 0x171   :  { %1390 = vst.msk [vmem:[%s2934_s3 + $0x7c] sm:$0xf] %vm1358_vm3, %v1653_v12  ;;  %v1651_v46 = vpack.c.bf16 %v1067_v4, %v1067_v4 }
 0x172   :  { %1422 = vst.msk [vmem:[%s2934_s3 + $0xfc] sm:$0xf] %vm1358_vm3, %v1685_v25  ;;  %v1683_v49 = vpack.c.bf16 %v1099_v0, %v1099_v0 }
 0x173   :  { %1388 = vst.msk [vmem:[%s2934_s3 + $0x74] sm:$0xf] %vm1358_vm3, %v1651_v46 }
 0x174   :  { %1420 = vst.msk [vmem:[%s2934_s3 + $0xf4] sm:$0xf] %vm1358_vm3, %v1683_v49 }

</bundles_post_ra>
